<compile_context>
chip_gen: v6e
topology: v6e:2x2x1
jax: 0.10.0
libtpu: 0.0.40
codegen_flags: <defaults>
</compile_context>

<pallas_src>
import jax
import jax.numpy as jnp
from jax import lax
from jax.experimental import pallas as pl
from jax.experimental.pallas import tpu as pltpu


# ----------------------------------------------------------------------------
# Tiny kernel: grid-invariant conditioning bias  = temb@Wt + cemb@Wc + bt+bc+b1
# ----------------------------------------------------------------------------
def _cond_bias_kernel(temb_ref, cemb_ref, wt_ref, wc_ref, bsum_ref, out_ref):
    t = jnp.dot(temb_ref[...], wt_ref[...], preferred_element_type=jnp.float32)
    c = jnp.dot(cemb_ref[...], wc_ref[...], preferred_element_type=jnp.float32)
    out_ref[...] = t + c + bsum_ref[...]


# ----------------------------------------------------------------------------
# Main fused ResBlock kernel (one (batch, row-tile) block per grid step)
# ----------------------------------------------------------------------------
def _resblock_kernel(x_mid_ref, x_top_ref, x_bot_ref, bias_ref,
                     w1_ref, w2_ref, b2_ref, wskip_ref, bskip_ref,
                     out_ref, xs_ref, hs_ref):
    _, T, W, Cin = x_mid_ref.shape
    Cout = out_ref.shape[-1]
    cdt = xs_ref.dtype                         # bf16 compute dtype for the MXU

    b = pl.program_id(0)
    r = pl.program_id(1)
    nr = pl.num_programs(1)

    # ---- assemble zero-padded silu(x) tile in VMEM scratch ------------------
    # xs holds silu(x) for image rows [R0-2, R0+T+2) with 1-col W zero padding.
    x_mid = x_mid_ref[0]                                            # (T, W, Cin) f32, kept for skip
    sx = jnp.concatenate(
        [jax.nn.silu(x_top_ref[0]),                                 # rows R0-2, R0-1
         jax.nn.silu(x_mid),                                        # rows R0 .. R0+T-1
         jax.nn.silu(x_bot_ref[0])],                                # rows R0+T, R0+T+1
        axis=0).astype(cdt)                                         # (T+4, W, Cin)
    zx = jnp.zeros((T + 4, 1, Cin), cdt)
    xs_ref[...] = jnp.concatenate([zx, sx, zx], axis=1)             # (T+4, W+2, Cin)

    @pl.when(r == 0)                      # halo rows above the image -> conv zero padding
    def _():
        xs_ref[0:2, :, :] = jnp.zeros((2, W + 2, Cin), cdt)

    @pl.when(r == nr - 1)                 # halo rows below the image
    def _():
        xs_ref[T + 2:T + 4, :, :] = jnp.zeros((2, W + 2, Cin), cdt)

    # ---- conv1: one im2col matmul, K = 9*Cin (bf16 in, f32 accumulate) ------
    rows1 = (T + 2) * W
    patches1 = jnp.concatenate(
        [xs_ref[dy:dy + T + 2, dx:dx + W, :].reshape(rows1, Cin)
         for dy in range(3) for dx in range(3)], axis=-1)           # (rows1, 9*Cin)
    h = jnp.dot(patches1, w1_ref[...], preferred_element_type=jnp.float32)
    h = h + bias_ref[pl.ds(b, 1), :]        # conv1 bias + time_mlp + condition_mlp (hoisted)
    h = jax.nn.silu(h).reshape(T + 2, W, Cout)

    # ---- stage h (rows R0-1 .. R0+T) with W zero padding for conv2 ----------
    zh = jnp.zeros((T + 2, 1, Cout), cdt)
    hs_ref[...] = jnp.concatenate([zh, h.astype(cdt), zh], axis=1)  # (T+2, W+2, Cout)

    @pl.when(r == 0)                      # conv2 zero-pads h outside the image, not conv1(-1)
    def _():
        hs_ref[0:1, :, :] = jnp.zeros((1, W + 2, Cout), cdt)

    @pl.when(r == nr - 1)
    def _():
        hs_ref[T + 1:T + 2, :, :] = jnp.zeros((1, W + 2, Cout), cdt)

    # ---- conv2 (im2col matmul, K = 9*Cout) + 1x1 skip ------------------------
    rows2 = T * W
    patches2 = jnp.concatenate(
        [hs_ref[dy:dy + T, dx:dx + W, :].reshape(rows2, Cout)
         for dy in range(3) for dx in range(3)], axis=-1)           # (rows2, 9*Cout)
    y = jnp.dot(patches2, w2_ref[...], preferred_element_type=jnp.float32) + b2_ref[...]
    skip = jnp.dot(x_mid.reshape(rows2, Cin), wskip_ref[...],       # skip kept in f32 (tiny K)
                   preferred_element_type=jnp.float32) + bskip_ref[...]
    out_ref[0] = (y + skip).reshape(T, W, Cout)


# ----------------------------------------------------------------------------
# Wrapper
# ----------------------------------------------------------------------------
def _pick_tile_h(H, W, Cin, Cout, vmem_budget=4 << 20):
    """Largest even divisor of H whose per-step working set fits the budget."""
    best = 2
    for t in range(2, H + 1, 2):
        if H % t:
            continue
        blocks = 4 * (t * W * (Cin + Cout) + 4 * W * Cin)                       # f32 blocks
        scratch = 2 * ((t + 4) * (W + 2) * Cin + (t + 2) * (W + 2) * Cout)      # bf16 scratch
        if 2 * blocks + scratch <= vmem_budget:                                  # ~double-buffered
            best = t
    return best


def resblock_forward(x_nchw, time_emb, cond_emb, params, *, tile_h=None):
    """Pallas ResBlock forward.  x_nchw: (B, Cin, H, W) like the torch module."""
    B, Cin, H, W = x_nchw.shape
    Cout = params["conv1_w"].shape[0]
    if tile_h is None:
        tile_h = _pick_tile_h(H, W, Cin, Cout)
    T = int(tile_h)
    assert H % T == 0 and T % 2 == 0, "tile_h must be an even divisor of H"

    x = jnp.transpose(x_nchw, (0, 2, 3, 1))                         # NHWC, f32

    # conv weights flattened tap-major for the im2col matmuls, cast to bf16.
    w1 = jnp.transpose(params["conv1_w"], (2, 3, 1, 0)).reshape(9 * Cin, Cout).astype(jnp.bfloat16)
    w2 = jnp.transpose(params["conv2_w"], (2, 3, 1, 0)).reshape(9 * Cout, Cout).astype(jnp.bfloat16)
    b2 = params["conv2_b"].reshape(1, Cout).astype(jnp.float32)

    if "skip_w" in params:                                          # in_ch != out_ch -> 1x1 conv
        wskip = jnp.transpose(params["skip_w"][:, :, 0, 0], (1, 0)).astype(jnp.float32)
        bskip = params["skip_b"].reshape(1, Cout).astype(jnp.float32)
    else:                                                           # Identity skip
        wskip = jnp.eye(Cin, Cout, dtype=jnp.float32)
        bskip = jnp.zeros((1, Cout), jnp.float32)

    wt = params["time_w"].T.astype(jnp.float32)                     # (time_dim, Cout)
    if cond_emb is not None and "cond_w" in params:
        wc = params["cond_w"].T.astype(jnp.float32)
        bc = params["cond_b"]
        cemb = cond_emb
    else:
        wc = jnp.zeros((1, Cout), jnp.float32)
        bc = jnp.zeros((Cout,), jnp.float32)
        cemb = jnp.zeros((B, 1), jnp.float32)
    bsum = (params["time_b"] + bc + params["conv1_b"]).reshape(1, Cout).astype(jnp.float32)

    # --- hoisted conditioning bias: (B, Cout) computed once -------------------
    vmem = pl.BlockSpec(memory_space=pltpu.MemorySpace.VMEM)
    bias = pl.pallas_call(
        _cond_bias_kernel,
        out_shape=jax.ShapeDtypeStruct((B, Cout), jnp.float32),
        in_specs=[vmem] * 5,
        out_specs=vmem,
    )(time_emb, cemb, wt, wc, bsum)

    # --- main fused kernel -----------------------------------------------------
    nr = H // T
    out_nhwc = pl.pallas_call(
        _resblock_kernel,
        out_shape=jax.ShapeDtypeStruct((B, H, W, Cout), jnp.float32),
        grid=(B, nr),
        in_specs=[
            # x tile body: rows [r*T, r*T+T)
            pl.BlockSpec((1, T, W, Cin), lambda b, r: (b, r, 0, 0)),
            # top halo: rows [r*T-2, r*T) (clamped; zeroed in-kernel when r == 0)
            pl.BlockSpec((1, 2, W, Cin),
                         lambda b, r: (b, jnp.maximum(r * (T // 2) - 1, 0), 0, 0)),
            # bottom halo: rows [r*T+T, r*T+T+2) (clamped; zeroed when r == nr-1)
            pl.BlockSpec((1, 2, W, Cin),
                         lambda b, r: (b, jnp.minimum((r + 1) * (T // 2), H // 2 - 1), 0, 0)),
            pl.BlockSpec((B, Cout), lambda b, r: (0, 0)),            # conditioning bias
            pl.BlockSpec((9 * Cin, Cout), lambda b, r: (0, 0)),      # w1 (bf16)
            pl.BlockSpec((9 * Cout, Cout), lambda b, r: (0, 0)),     # w2 (bf16)
            pl.BlockSpec((1, Cout), lambda b, r: (0, 0)),            # conv2 bias
            pl.BlockSpec((Cin, Cout), lambda b, r: (0, 0)),          # skip weight
            pl.BlockSpec((1, Cout), lambda b, r: (0, 0)),            # skip bias
        ],
        out_specs=pl.BlockSpec((1, T, W, Cout), lambda b, r: (b, r, 0, 0)),
        scratch_shapes=[
            pltpu.VMEM((T + 4, W + 2, Cin), jnp.bfloat16),           # padded silu(x) tile
            pltpu.VMEM((T + 2, W + 2, Cout), jnp.bfloat16),          # padded h tile
        ],
        compiler_params=pltpu.CompilerParams(
            dimension_semantics=("parallel", "parallel")),
    )(x, x, x, bias, w1, w2, b2, wskip, bskip)

    return jnp.transpose(out_nhwc, (0, 3, 1, 2))                     # back to NCHW


# ----------------------------------------------------------------------------
# Params + pure-JAX reference (mirrors the PyTorch forward exactly, f32)
# ----------------------------------------------------------------------------
def init_params(key, in_ch, out_ch, time_dim, cond_dim):
    ks = jax.random.split(key, 10)

    def nrm(k, shape, scale=0.1):
        return scale * jax.random.normal(k, shape, jnp.float32)

    return {
        "time_w":  nrm(ks[0], (out_ch, time_dim)),    # nn.Linear(time_dim, out_ch)
        "time_b":  nrm(ks[1], (out_ch,)),
        "cond_w":  nrm(ks[2], (out_ch, cond_dim)),    # nn.Linear(condition_dim, out_ch)
        "cond_b":  nrm(ks[3], (out_ch,)),
        "conv1_w": nrm(ks[4], (out_ch, in_ch, 3, 3)),
        "conv1_b": nrm(ks[5], (out_ch,)),
        "conv2_w": nrm(ks[6], (out_ch, out_ch, 3, 3)),
        "conv2_b": nrm(ks[7], (out_ch,)),
        "skip_w":  nrm(ks[8], (out_ch, in_ch, 1, 1)),  # 1x1 skip conv (in_ch != out_ch)
        "skip_b":  nrm(ks[9], (out_ch,)),
    }


def resblock_reference(x, temb, cemb, p):
    def conv(h, w, b, pad):
        out = lax.conv_general_dilated(
            h, w, (1, 1), [(pad, pad), (pad, pad)],
            dimension_numbers=("NCHW", "OIHW", "NCHW"))
        return out + b[None, :, None, None]

    h = jax.nn.silu(x)                       # norm1 = Identity
    h = conv(h, p["conv1_w"], p["conv1_b"], 1)
    t = temb @ p["time_w"].T + p["time_b"]
    h = h + t[:, :, None, None]
    c = cemb @ p["cond_w"].T + p["cond_b"]
    h = h + c[:, :, None, None]
    h = jax.nn.silu(h)                       # norm2 = Identity
    h = conv(h, p["conv2_w"], p["conv2_b"], 1)
    skip = conv(x, p["skip_w"], p["skip_b"], 0)
    return h + skip


if __name__ == "__main__":
    B, Cin, Cout, H, W = 2, 4, 8, 16, 16
    time_dim, cond_dim = 32, 16

    key = jax.random.PRNGKey(0)
    kx, kt, kc, kp = jax.random.split(key, 4)
    x = jax.random.normal(kx, (B, Cin, H, W), jnp.float32)
    temb = jax.random.normal(kt, (B, time_dim), jnp.float32)
    cemb = jax.random.normal(kc, (B, cond_dim), jnp.float32)
    params = init_params(kp, Cin, Cout, time_dim, cond_dim)

    ref = resblock_reference(x, temb, cemb, params)

    # exercise single-tile, two-tile (first/last) and four-tile (interior) row tilings
    for tile_h in (4, 8, 16):
        out = jax.block_until_ready(resblock_forward(x, temb, cemb, params, tile_h=tile_h))
        assert out.shape == ref.shape == (B, Cout, H, W)
        err = float(jnp.max(jnp.abs(out - ref)))
        # bf16 MXU matmuls (f32 accumulation) vs the all-f32 reference
        if err > 5e-2:
            raise AssertionError(f"tile_h={tile_h}: Pallas kernel mismatch, max abs err {err}")

    print("KERNEL_OK")
</pallas_src>

<mosaic_0001>
module attributes {stable_mosaic.version = 11 : i64} {
  func.func @_cond_bias_kernel(%arg0: memref<2x32xf32, #tpu.memory_space<vmem>>, %arg1: memref<2x16xf32, #tpu.memory_space<vmem>>, %arg2: memref<32x8xf32, #tpu.memory_space<vmem>>, %arg3: memref<16x8xf32, #tpu.memory_space<vmem>>, %arg4: memref<1x8xf32, #tpu.memory_space<vmem>>, %arg5: memref<2x8xf32, #tpu.memory_space<vmem>>) attributes {dimension_semantics = [], scalar_prefetch = 0 : i64, scratch_operands = 0 : i64, tpu.core_type = #tpu.core_type<tc>} {
    %c0 = arith.constant 0 : index
    %c0_0 = arith.constant 0 : index
    %0 = vector.load %arg0[%c0, %c0_0] : memref<2x32xf32, #tpu.memory_space<vmem>>, vector<2x32xf32>
    %c0_1 = arith.constant 0 : index
    %c0_2 = arith.constant 0 : index
    %1 = vector.load %arg2[%c0_1, %c0_2] : memref<32x8xf32, #tpu.memory_space<vmem>>, vector<32x8xf32>
    %cst = arith.constant dense<0.000000e+00> : vector<2x8xf32>
    %2 = tpu.matmul %0, %1, %cst {dimension_numbers = #tpu.dot_dimension_numbers<[1], [0], [0], [1], [0, 0, 1, 1], [], []>} : vector<2x32xf32>, vector<32x8xf32>, vector<2x8xf32> -> vector<2x8xf32>
    %c0_3 = arith.constant 0 : index
    %c0_4 = arith.constant 0 : index
    %3 = vector.load %arg1[%c0_3, %c0_4] : memref<2x16xf32, #tpu.memory_space<vmem>>, vector<2x16xf32>
    %c0_5 = arith.constant 0 : index
    %c0_6 = arith.constant 0 : index
    %4 = vector.load %arg3[%c0_5, %c0_6] : memref<16x8xf32, #tpu.memory_space<vmem>>, vector<16x8xf32>
    %cst_7 = arith.constant dense<0.000000e+00> : vector<2x8xf32>
    %5 = tpu.matmul %3, %4, %cst_7 {dimension_numbers = #tpu.dot_dimension_numbers<[1], [0], [0], [1], [0, 0, 1, 1], [], []>} : vector<2x16xf32>, vector<16x8xf32>, vector<2x8xf32> -> vector<2x8xf32>
    %6 = arith.addf %2, %5 : vector<2x8xf32>
    %c0_8 = arith.constant 0 : index
    %c0_9 = arith.constant 0 : index
    %7 = vector.load %arg4[%c0_8, %c0_9] : memref<1x8xf32, #tpu.memory_space<vmem>>, vector<1x8xf32>
    %8 = vector.broadcast %7 : vector<1x8xf32> to vector<2x8xf32>
    %9 = arith.addf %6, %8 : vector<2x8xf32>
    %c0_10 = arith.constant 0 : index
    %c0_11 = arith.constant 0 : index
    %10 = vector.load %arg5[%c0_10, %c0_11] : memref<2x8xf32, #tpu.memory_space<vmem>>, vector<2x8xf32>
    tpu.vector_store %arg5[%c0_10, %c0_11], %9 {strides = array<i32>} : memref<2x8xf32, #tpu.memory_space<vmem>>, vector<2x8xf32>,
    return
  }
}

</mosaic_0001>

<bundles_post_ra>
// kernel: tpu_custom_call.1
= control target key start
LH: loop header
LB: loop body
LE: loop exit
PB: predicated region body
PF: predicated region fallthrough
CT: control target
= control target key end

     0   :  { %v255_v2 = vmov 0.0   ;;  %s318_s0 = inlined_call_operand.vmem [shape: f32[2,32], index: 0, kind: input, shape index: {}]   ;;  %s319_s1 = inlined_call_operand.vmem [shape: f32[2,16], index: 1, kind: input, shape index: {}]   ;;  %s320_s2 = inlined_call_operand.vmem [shape: f32[32,8], index: 2, kind: input, shape index: {}]   ;;  %s321_s3 = inlined_call_operand.vmem [shape: f32[16,8], index: 3, kind: input, shape index: {}]   ;;  %s322_s4 = inlined_call_operand.vmem [shape: f32[1,8], index: 4, kind: input, shape index: {}]   ;;  %s323_s5 = inlined_call_operand.hbm [shape: f32[2,8], index: 5, kind: output, shape index: {}]  }
   0x1   :  { %v25_v0 = vld [vmem:[%s320_s2 + $0x18] sm:$0xff]  ;;  %v28_v1 = vld [vmem:[%s321_s3 + $0x8] sm:$0xff]  ;;  %219 = vmatprep.subr.mxu1 %v255_v2  ;;  %212 = vmatprep.subr.mxu0 %v255_v2  ;;  %v24_v3 = vld [vmem:[%s320_s2 + $0x10] sm:$0xff] }
   0x2   :  { %v27_v4 = vld [vmem:[%s321_s3] sm:$0xff]  ;;  %220 = vmatpush3.msra.mxu1 %v25_v0  ;;  %213 = vmatpush3.msra.mxu0 %v28_v1 }
   0x3   :  { %10 = vsyncpa [#allocation3], 0  ;;  %221 = vmatprep.subr.mxu1 %v255_v2  ;;  %214 = vmatprep.subr.mxu0 %v255_v2  ;;  %v23_v5 = vld [vmem:[%s320_s2 + $0x8] sm:$0xff]  ;;  %v26_v6 = vld [vmem:[%s319_s1] sm:$0x3]  ;;  %vm29_vm0 = vcmask 130048  }
   0x4   :  { %222 = vmatpush3.msra.mxu1 %v24_v3  ;;  %215 = vmatpush3.msra.mxu0 %v27_v4  ;;  %vm256_vm1 = vmmov 0   ;;  %v22_v7 = vld [vmem:[%s320_s2] sm:$0xff]  ;;  %vm103_vm2 = vcmask 261120   ;;  %s257_s9 = smov [#allocation2]   ;;  %vm185_vm3 = vcmask 58368  }
   0x5   :  { %223 = vmatprep.subr.mxu1 %v255_v2  ;;  %216 = vmatprep.mubr.msk.f32.mxu0 %vm256_vm1, %v255_v2  ;;  %v21_v8 = vld [vmem:[%s318_s0] sm:$0x3]  ;;  %s193_s2 = sshll.u32 %s257_s9, 4  ;;  %s194_s2 = int_to_ptr.vmem [resolvable:$true] %s193_s2 }
   0x6   :  { %224 = vmatpush3.msra.mxu1 %v23_v5  ;;  %217 = vmatmul.mubr.msk.f32.vlgmr.msra.gmra.mxu0 %vm29_vm0, %v26_v6  ;;  %v203_v12 = vld [vmem:[%s322_s4] ss:$0 sm:$0xff]  ;;  %s233_s0 = scalar_lea.vmem %s194_s2, 32  ;;  %p238_p1 = scmp.lt.s32.totalorder %s194_s2, %s194_s2 }
   0x7   :  { %225 = vmatprep.subr.mxu1 %v255_v2  ;;  %227 = vmatprep.mubr.msk.f32.mxu1 %vm256_vm1, %v255_v2  ;;  %p234_p0 = scmp.ne.s32.totalorder %s194_s2, %s233_s0  ;;  %p239_p2 = scmp.lt.s32.totalorder %s233_s0, %s233_s0 }
   0x8   :  { %226 = vmatpush3.msra.mxu1 %v22_v7 }
   0x9   :  { %228 = vmatmul.mubr.msk.f32.vlgmr.msra.gmra.mxu1 %vm103_vm2, %v21_v8  ;;  %p240_p3 = por %p239_p2, %p238_p1 }
   0xb   :  { %p241_p4 = pnand %p240_p3, %p234_p0 }
  0xc6   :  { %v99_v9 = vpop.f32.mrf.mxu0 }
  0xc8   :  { %v218_v10 = vpop.f32.mrf.mxu0 }
  0xc9   :  { %v173_v11 = vpop.f32.mrf.mxu1 }
  0xca   :  { %v174_v13 = vadd.f32 %v173_v11, %v99_v9 }
  0xcb   :  { %v229_v14 = vpop.f32.mrf.mxu1 }
  0xcc   :  { %v184_v15 = vadd.f32 %v203_v12, %v174_v13 }
  0xce   :  { %186 = vst.msk [vmem:[#allocation2] sm:$0x3] %vm185_vm3, %v184_v15 }
  0xcf   :  { %244 = shalt.err (!%p241_p4)
}
  0xd0   :  { %196 = dma.vmem_to_hbm [thread:$0]  %s194_s2, 32, %s323_s5, [#allocation3]  }
  0xd1   :  { %253 = dma.done.wait [#allocation3], 32  }
  0xd2   :  { %254 = vsyncadd [#allocation3], 4294967264 }
  0xd3   :  { %200 = vsyncpa [#allocation3], 1 }

</bundles_post_ra>
